<compile_context>
chip_gen: v5e
topology: v5e:2x2
jax: 0.10.0
libtpu: 0.0.40
codegen_flags: <defaults>
</compile_context>

<pallas_src>
import jax
import jax.numpy as jnp
from jax.experimental import pallas as pl
from jax.experimental.pallas import tpu as pltpu

LANES = 128                     # vreg lane width; slab last dim
TILE_ROWS = 4096                # 4096 * 128 * 4 B = 2 MiB per f32 block
SMALL_BATCH_ELEMS = 64 * 1024   # < 256 KiB of f32 -> plain jnp fast path


def _round_up(n, m):
    return -(-n // m) * m


def _linear_square_kernel(w_ref, b_ref, x_ref, o_ref):
    # w_ref / b_ref: (1,) scalars in SMEM; x_ref / o_ref: (tile_rows, 128) VMEM.
    w = w_ref[0]
    b = b_ref[0]
    y = x_ref[...] * w + b          # nn.Linear(1, 1): x @ W^T + b
    o_ref[...] = y * y              # MySquare.forward: i ** 2


def linear_square(x, weight, bias, *, min_kernel_elems=SMALL_BATCH_ELEMS):
    """y = (x @ W^T + b) ** 2 for Linear(1, 1). x: (..., 1); returns same shape."""
    assert x.shape[-1] == 1, "Model.linear has in_features=1"
    orig_shape = x.shape
    dtype = x.dtype
    w = weight.reshape(-1).astype(dtype)   # (1,)
    b = bias.reshape(-1).astype(dtype)     # (1,)
    batch = x.size

    # ---- Small-batch fast path: launch/DMA overhead would dominate. ----
    if batch < min_kernel_elems:
        y = x * w[0] + b[0]
        return y * y

    # ---- Lane-dense repack: (batch,) -> (rows, 128) slab. ----
    flat = x.reshape(-1)
    rows = max(pl.cdiv(batch, LANES), 8)   # >= 8 rows so an (8,128) block is valid
    pad = rows * LANES - batch             # <= 1023 elements; 0 when batch % 128 == 0
    if pad:
        flat = jnp.pad(flat, (0, pad))     # only extra HBM pass, ragged batches only
    slab = flat.reshape(rows, LANES)

    # ~2 MiB blocks, but keep >= 2 grid steps when possible (v7x megacore).
    # Grid uses cdiv: the trailing block may be partial (no tile-multiple pad).
    tile_rows = max(8, min(TILE_ROWS, _round_up(pl.cdiv(rows, 2), 8)))
    num_tiles = pl.cdiv(rows, tile_rows)

    out_slab = pl.pallas_call(
        _linear_square_kernel,
        out_shape=jax.ShapeDtypeStruct((rows, LANES), dtype),
        grid=(num_tiles,),
        in_specs=[
            pl.BlockSpec(memory_space=pltpu.MemorySpace.SMEM),     # w scalar
            pl.BlockSpec(memory_space=pltpu.MemorySpace.SMEM),     # b scalar
            pl.BlockSpec((tile_rows, LANES), lambda i: (i, 0)),    # x tile
        ],
        out_specs=pl.BlockSpec((tile_rows, LANES), lambda i: (i, 0)),
        compiler_params=pltpu.CompilerParams(
            dimension_semantics=("parallel",),     # shard steps across v7x's 2 TCs
            vmem_limit_bytes=32 * 1024 * 1024,     # 4 x 2 MiB buffers, all gens safe
        ),
        # Padded slab is a wrapper temporary: reuse its HBM buffer for the
        # output (real win under jit; harmless under eager dispatch).
        input_output_aliases=({2: 0} if pad else {}),
    )(w, b, slab)

    out_flat = out_slab.reshape(-1)
    if pad:
        out_flat = out_flat[:batch]        # identity (free) when pad == 0
    return out_flat.reshape(orig_shape)


if __name__ == "__main__":
    key = jax.random.PRNGKey(0)
    kx, kw, kb, kx2, kx3 = jax.random.split(key, 5)

    # Linear(1, 1) parameters: weight (1, 1), bias (1,).
    w = jax.random.uniform(kw, (1, 1), jnp.float32, minval=-1.0, maxval=1.0)
    b = jax.random.uniform(kb, (1,), jnp.float32, minval=-1.0, maxval=1.0)

    def ref_fn(x):
        # x @ W^T + b with in/out features 1 == x * W[0,0] + b[0].
        return (x * w[0, 0] + b[0]) ** 2

    # 1) Small shape consistent with the module (batch=8, features=1):
    #    exercises the small-batch jnp fast path.
    x_small = jax.random.normal(kx, (8, 1), jnp.float32)
    out_small = jax.block_until_ready(linear_square(x_small, w, b))
    assert out_small.shape == (8, 1)
    assert jnp.allclose(out_small, ref_fn(x_small), atol=1e-6), "fast path mismatch"

    # 2) Same small shape forced through the Pallas kernel path (single block).
    out_small_k = jax.block_until_ready(linear_square(x_small, w, b, min_kernel_elems=0))
    assert out_small_k.shape == (8, 1)
    assert jnp.allclose(out_small_k, ref_fn(x_small), atol=1e-6), "kernel (tiny) mismatch"

    # 3) Ragged batch: multi-step grid, partial trailing block, tail padding.
    batch2 = TILE_ROWS * LANES * 2 + 37
    x2 = jax.random.normal(kx2, (batch2, 1), jnp.float32)
    out2 = jax.block_until_ready(linear_square(x2, w, b))
    assert out2.shape == (batch2, 1)
    assert jnp.allclose(out2, ref_fn(x2), atol=1e-6), "kernel (ragged) mismatch"

    # 4) batch % 128 == 0: zero-copy wrapper path (no pad, no slice copy),
    #    2-step grid with a partial second block.
    batch3 = TILE_ROWS * LANES + 3 * LANES
    x3 = jax.random.normal(kx3, (batch3, 1), jnp.float32)
    out3 = jax.block_until_ready(linear_square(x3, w, b))
    assert out3.shape == (batch3, 1)
    assert jnp.allclose(out3, ref_fn(x3), atol=1e-6), "kernel (no-pad) mismatch"

    print("KERNEL_OK")
</pallas_src>

<mosaic_0001>
module attributes {stable_mosaic.version = 11 : i64} {
  func.func @_linear_square_kernel(%arg0: i32, %arg1: memref<1xf32, #tpu.memory_space<smem>>, %arg2: memref<1xf32, #tpu.memory_space<smem>>, %arg3: memref<8x128xf32, #tpu.memory_space<vmem>>, %arg4: memref<8x128xf32, #tpu.memory_space<vmem>>) attributes {dimension_semantics = [#tpu.dimension_semantics<parallel>], iteration_bounds = array<i64: 1>, scalar_prefetch = 0 : i64, scratch_operands = 0 : i64, tpu.core_type = #tpu.core_type<tc>, window_params = [{transform_indices = @transform_0, window_bounds = array<i64: 1>}, {transform_indices = @transform_1, window_bounds = array<i64: 1>}, {transform_indices = @transform_2, window_bounds = array<i64: 8, 128>}, {transform_indices = @transform_3, window_bounds = array<i64: 8, 128>}]} {
    %c0 = arith.constant 0 : index
    %0 = memref.load %arg1[%c0] : memref<1xf32, #tpu.memory_space<smem>>
    %c0_0 = arith.constant 0 : index
    %1 = memref.load %arg2[%c0_0] : memref<1xf32, #tpu.memory_space<smem>>
    %c0_1 = arith.constant 0 : index
    %c0_2 = arith.constant 0 : index
    %2 = vector.load %arg3[%c0_1, %c0_2] : memref<8x128xf32, #tpu.memory_space<vmem>>, vector<8x128xf32>
    %3 = vector.broadcast %0 : f32 to vector<8x128xf32>
    %4 = arith.mulf %2, %3 : vector<8x128xf32>
    %5 = vector.broadcast %1 : f32 to vector<8x128xf32>
    %6 = arith.addf %4, %5 : vector<8x128xf32>
    %7 = arith.mulf %6, %6 : vector<8x128xf32>
    %c0_3 = arith.constant 0 : index
    %c0_4 = arith.constant 0 : index
    %8 = vector.load %arg4[%c0_3, %c0_4] : memref<8x128xf32, #tpu.memory_space<vmem>>, vector<8x128xf32>
    tpu.vector_store %arg4[%c0_3, %c0_4], %7 {strides = array<i32>} : memref<8x128xf32, #tpu.memory_space<vmem>>, vector<8x128xf32>,
    return
  }
  func.func @transform_0(%arg0: i32) -> i32 {
    %c0_i32 = arith.constant 0 : i32
    %c0_i32_0 = arith.constant 0 : i32
    return %c0_i32 : i32
  }
  func.func @transform_1(%arg0: i32) -> i32 {
    %c0_i32 = arith.constant 0 : i32
    %c0_i32_0 = arith.constant 0 : i32
    return %c0_i32 : i32
  }
  func.func @transform_2(%arg0: i32) -> (i32, i32) {
    %c0_i32 = arith.constant 0 : i32
    %c0_i32_0 = arith.constant 0 : i32
    return %arg0, %c0_i32 : i32, i32
  }
  func.func @transform_3(%arg0: i32) -> (i32, i32) {
    %c0_i32 = arith.constant 0 : i32
    %c0_i32_0 = arith.constant 0 : i32
    return %arg0, %c0_i32 : i32, i32
  }
}

</mosaic_0001>

<bundles_post_ra>
// kernel: tpu_custom_call.1
= control target key start
LH: loop header
LB: loop body
LE: loop exit
PB: predicated region body
PF: predicated region fallthrough
CT: control target
= control target key end

     0   :  { %10 = vsyncpa [#allocation5], 0  ;;  %s145_s0 = inlined_call_operand.<no memory space> [shape: f32[1], index: 0, kind: input, shape index: {}]   ;;  %s146_s1 = inlined_call_operand.<no memory space> [shape: f32[1], index: 1, kind: input, shape index: {}]   ;;  %s147_s2 = inlined_call_operand.hbm [shape: f32[8,128], index: 2, kind: input, shape index: {}, may-alias: {2,3}]   ;;  %s148_s3 = inlined_call_operand.hbm [shape: f32[8,128], index: 3, kind: output, shape index: {}, may-alias: {2,3}]  }
   0x1   :  { %11 = vsyncpa [#allocation6], 0  ;;  %s21_s14 = sshll.u32 %s147_s2, 4  ;;  %s111_s15 = smov [#allocation4]   ;;  %s22_s14 = int_to_ptr.hbm [resolvable:$true] %s21_s14 }
   0x2   :  { %s23_s16 = sshll.u32 %s111_s15, 4  ;;  %s24_s16 = int_to_ptr.vmem [resolvable:$true] %s23_s16 }
   0x3   :  { %26 = dma.hbm_to_vmem [thread:$0]  %s22_s14, 128, %s24_s16, [#allocation5]  }
   0x4   :  { %107 = dma.done.wait [#allocation5], 128  }
   0x5   :  { %108 = vsyncadd [#allocation5], 4294967168  ;;  %v34_v0 = vstv %s145_s0  ;;  %v33_v1 = vld [vmem:[#allocation4] sm:$0xff]  ;;  %v36_v2 = vstv %s146_s1  ;;  %s112_s21 = smov [#allocation7]   ;;  %s47_s24 = sshll.u32 %s148_s3, 4  ;;  %s48_s24 = int_to_ptr.hbm [resolvable:$true] %s47_s24 }
   0x6   :  { %v35_v3 = vmul.f32 %v34_v0, %v33_v1  ;;  %s45_s22 = sshll.u32 %s112_s21, 4  ;;  %s46_s22 = int_to_ptr.vmem [resolvable:$true] %s45_s22 }
   0x8   :  { %v37_v4 = vadd.f32 %v36_v2, %v35_v3 }
   0xa   :  { %v38_v5 = vmul.f32 %v37_v4, %v37_v4 }
   0xc   :  { %39 = vst [vmem:[#allocation7] sm:$0xff] %v38_v5 }
   0xd   :  { %50 = dma.vmem_to_hbm [thread:$0]  %s46_s22, 128, %s48_s24, [#allocation6]  }
   0xe   :  { %109 = dma.done.wait [#allocation6], 128  }
   0xf   :  { %110 = vsyncadd [#allocation6], 4294967168 }
  0x10   :  { %55 = vsyncpa [#allocation5], 1 }
  0x11   :  { %56 = vsyncpa [#allocation6], 1 }

</bundles_post_ra>
